<compile_context>
chip_gen: v7x
topology: tpu7x:2x2x1
jax: 0.10.0
libtpu: 0.0.40
codegen_flags: <defaults>
</compile_context>

<pallas_src>
import functools

import numpy as np

import jax
import jax.numpy as jnp
from jax import lax
from jax.experimental import pallas as pl
from jax.experimental.pallas import tpu as pltpu


def _round_up(a, b):
    return (a + b - 1) // b * b


# ----------------------------- Pallas kernels ------------------------------

def conv_bn_stats_kernel(x_ref, w_ref, tapmask_ref, vmask_ref,
                         y_ref, psum_ref, pm2_ref, *,
                         kh, kw, row_stride, stride, tm, guard, col_shift,
                         needs_mask, single_tile):
    """Streamed conv (kh*kw shifted matmuls) fused with BN partial statistics.

    x_ref      : (Cin8, Lx)        bf16  whole padded/flattened input, batch b
    w_ref      : (kh*kw, C8, Cin8) bf16  per-tap weight matrices
    tapmask_ref: (kw, tm)          f32   per-kernel-column lane mask (horizontal
                                          wrap of the un-W-padded layout)
    vmask_ref  : (1, tm)           f32   valid-output-column mask (BN stats)
    y_ref      : (C8, tm)          f32   conv output tile, channel-major
    psum_ref   : (C8, 1)           f32   per-tile masked channel sums
    pm2_ref    : (C8, 1)           f32   per-tile centered sum-of-squares
    """
    if single_tile:
        base = 0                                   # static slice starts
    else:
        base = pl.program_id(1) * (tm * stride)    # dynamic lane offsets

    c8 = y_ref.shape[0]
    acc = jnp.zeros((c8, tm), jnp.float32)
    for i in range(kh):
        for j in range(kw):
            start = guard + i * row_stride + j - col_shift + base
            if stride == 1:
                xw = x_ref[:, pl.ds(start, tm)]
            else:
                xw = x_ref[:, pl.ds(start, tm, stride)]
            # (C8, Cin8) @ (Cin8, tm) -> (C8, tm), f32 MXU accumulate.
            part = lax.dot_general(
                w_ref[i * kw + j], xw,
                dimension_numbers=(((1,), (0,)), ((), ())),
                preferred_element_type=jnp.float32)
            if needs_mask[j]:
                # Zero the taps that would read a horizontally wrapped pixel.
                part = part * tapmask_ref[j:j + 1, :]
            acc = acc + part

    # Mean-centered per-tile partials (better conditioned than raw sum-of-sq).
    vm = vmask_ref[...]                                   # (1, tm)
    cnt = jnp.sum(vm, axis=1, keepdims=True)              # (1, 1)
    s = jnp.sum(acc * vm, axis=1, keepdims=True)          # (C8, 1)
    mu = s / jnp.maximum(cnt, 1.0)
    d = (acc - mu) * vm
    psum_ref[...] = s
    pm2_ref[...] = jnp.sum(d * d, axis=1, keepdims=True)

    y_ref[...] = acc


def bn_apply_kernel(y_ref, scale_ref, shift_ref, o_ref, *, cout, m_out):
    """y * scale + shift.  Channels on sublanes; scale/shift broadcast on lanes."""
    o_ref[...] = y_ref[:cout, :m_out] * scale_ref[...] + shift_ref[...]


# ------------------------------- JAX glue ----------------------------------

@functools.partial(jax.jit, static_argnames=("stride", "padding", "eps"))
def channel_fixer_forward(x, weight, gamma, beta, *, stride, padding, eps=1e-5):
    """ReLU -> Conv2d(weight, bias=False) -> BatchNorm2d (training-mode stats)."""
    n, cin, h, w = x.shape
    cout, _, kh, kw = weight.shape

    ho = (h + 2 * padding - kh) // stride + 1
    wo = (w + 2 * padding - kw) // stride + 1

    cin_p = _round_up(cin, 8)
    c8 = _round_up(cout, 8)

    # "Dense" fast path (stride 1, output width >= input width, e.g. 'same'
    # 3x3 / 1x1 channel fixers): the flat output q-space has NO junk columns,
    # horizontal zero-padding is realised through per-tap lane masks, and the
    # final output needs no compaction slice.  Otherwise fall back to a
    # W_p-strided q-space with junk columns and one trailing XLA slice.
    if stride == 1 and wo >= w:
        dense = True
        row_stride = wo            # flat row stride of the input slab
        col_shift = padding        # taps read column (wo + j - padding)
        guard = padding            # zero columns in front (avoid negative ds)
        wpad = (0, row_stride - w)
    else:
        dense = False
        row_stride = w + 2 * padding
        col_shift = 0
        guard = 0
        wpad = (padding, padding)

    mq = ho * (wo if dense else row_stride)        # computed output columns
    m_valid = ho * wo                              # true output count per image

    # Spatial tile: full extent when small (static slice starts), else 2048.
    tm = _round_up(mq, 128)
    if tm > 4096:
        tm = 2048
    num_i = -(-mq // tm)
    my = num_i * tm

    # ---- build the padded, flattened, ReLU'd bf16 input slab (1x traffic) ---
    xr = jnp.maximum(x, 0.0).astype(jnp.bfloat16)                  # ReLU first
    if cin_p != cin:
        xr = jnp.pad(xr, ((0, 0), (0, cin_p - cin), (0, 0), (0, 0)))
    xr = jnp.pad(xr, ((0, 0), (0, 0), (padding, padding), wpad))
    body = xr.reshape(n, cin_p, (h + 2 * padding) * row_stride)
    body_len = body.shape[-1]

    max_start = (guard + (kh - 1) * row_stride + (kw - 1) - col_shift
                 + stride * (my - 1))
    lx = _round_up(max(max_start + 1, guard + body_len), 128)
    lead = jnp.zeros((n, cin_p, guard), jnp.bfloat16)
    tail = jnp.zeros((n, cin_p, lx - guard - body_len), jnp.bfloat16)
    xf = jnp.concatenate([lead, body, tail], axis=-1)              # (n,Cin8,Lx)

    # Weights: (Cout, Cin, kh, kw) -> (kh*kw, C8, Cin8) bf16 per-tap matrices.
    wt = weight.astype(jnp.bfloat16).transpose(2, 3, 0, 1).reshape(kh * kw, cout, cin)
    wt = jnp.pad(wt, ((0, 0), (0, c8 - cout), (0, cin_p - cin)))

    # ---- trace-time constant masks (numpy) ----------------------------------
    q = np.arange(my)
    tap = np.ones((kw, my), np.float32)
    if dense:
        col = (q % row_stride)[None, :] + np.arange(kw)[:, None] - col_shift
        tap = ((col >= 0) & (col < w)).astype(np.float32)
        valid = (q < m_valid).astype(np.float32)
    else:
        valid = ((q < mq) & ((q % row_stride) < wo)).astype(np.float32)
    needs_mask = tuple(bool((tap[j] < 0.5).any()) for j in range(kw))
    tapmask = jnp.asarray(tap)                       # (kw, my)
    vmask = jnp.asarray(valid.reshape(1, my))        # (1, my)

    # ---- pass 1: fused conv + BN partials ------------------------------------
    y_q, psum, pm2 = pl.pallas_call(
        functools.partial(conv_bn_stats_kernel, kh=kh, kw=kw,
                          row_stride=row_stride, stride=stride, tm=tm,
                          guard=guard, col_shift=col_shift,
                          needs_mask=needs_mask, single_tile=(num_i == 1)),
        grid=(n, num_i),
        in_specs=[
            # whole per-batch input slab; constant over the spatial axis ->
            # fetched once per batch step.
            pl.BlockSpec((None, cin_p, lx), lambda b, i: (b, 0, 0)),
            pl.BlockSpec((kh * kw, c8, cin_p), lambda b, i: (0, 0, 0)),
            pl.BlockSpec((kw, tm), lambda b, i: (0, i)),
            pl.BlockSpec((1, tm), lambda b, i: (0, i)),
        ],
        out_specs=(
            pl.BlockSpec((None, c8, tm), lambda b, i: (b, 0, i)),
            pl.BlockSpec((None, None, c8, 1), lambda b, i: (b, i, 0, 0)),
            pl.BlockSpec((None, None, c8, 1), lambda b, i: (b, i, 0, 0)),
        ),
        out_shape=(
            jax.ShapeDtypeStruct((n, c8, my), jnp.float32),
            jax.ShapeDtypeStruct((n, num_i, c8, 1), jnp.float32),
            jax.ShapeDtypeStruct((n, num_i, c8, 1), jnp.float32),
        ),
        compiler_params=pltpu.CompilerParams(
            dimension_semantics=("parallel", "parallel")),
    )(xf, wt, tapmask, vmask)

    # ---- tiny host math: Chan-combine partials -> BN scale / shift ----------
    counts = jnp.asarray(valid.reshape(num_i, tm).sum(axis=1),
                         jnp.float32).reshape(1, num_i, 1, 1)
    total = jnp.float32(n * ho * wo)
    ch_sum = jnp.sum(psum, axis=(0, 1))                     # (C8, 1)
    mean = ch_sum / total
    mu_t = psum / jnp.maximum(counts, 1.0)
    m2 = (jnp.sum(pm2, axis=(0, 1))
          + jnp.sum(counts * (mu_t - mean) ** 2, axis=(0, 1)))
    var = jnp.maximum(m2 / total, 0.0)                      # biased (PyTorch fwd)

    mean_c = mean[:cout]
    var_c = var[:cout]
    scale = gamma.astype(jnp.float32).reshape(cout, 1) * lax.rsqrt(var_c + eps)
    shift = beta.astype(jnp.float32).reshape(cout, 1) - mean_c * scale

    # ---- pass 2: normalize + affine; one whole-batch block per step ---------
    # TODO(synk): row-tile pass 2 for very large feature maps (per-batch slab
    # must fit scoped VMEM).
    out_flat = pl.pallas_call(
        functools.partial(bn_apply_kernel, cout=cout, m_out=mq),
        grid=(n,),
        in_specs=[
            pl.BlockSpec((None, c8, my), lambda b: (b, 0, 0)),
            pl.BlockSpec((cout, 1), lambda b: (0, 0)),      # grid-invariant
            pl.BlockSpec((cout, 1), lambda b: (0, 0)),      # grid-invariant
        ],
        out_specs=pl.BlockSpec((None, cout, mq), lambda b: (b, 0, 0)),
        out_shape=jax.ShapeDtypeStruct((n, cout, mq), jnp.float32),
        compiler_params=pltpu.CompilerParams(
            dimension_semantics=("parallel",)),
    )(y_q, scale, shift)

    if dense:
        # Exact Ho*Wo extent already -- the reshape is free (no extra HBM pass).
        return out_flat.reshape(n, cout, ho, wo)
    # TODO(synk): fold this junk-column compaction of strided / non-'same'
    # convs into pass 2 (4-D block view) to avoid the extra XLA slice pass.
    return out_flat.reshape(n, cout, ho, row_stride)[:, :, :, :wo]


# ----------------------------- pure-JAX reference ---------------------------

def channel_fixer_reference(x, weight, gamma, beta, stride, padding, eps=1e-5):
    # Match the kernel's deliberate bf16 MXU inputs (f32 accumulation) so the
    # comparison isolates kernel correctness from the bf16 quantization choice.
    xr = jnp.maximum(x.astype(jnp.float32), 0.0).astype(jnp.bfloat16).astype(jnp.float32)
    wf = weight.astype(jnp.bfloat16).astype(jnp.float32)
    y = lax.conv_general_dilated(
        xr, wf, (stride, stride),
        [(padding, padding), (padding, padding)],
        dimension_numbers=("NCHW", "OIHW", "NCHW"),
        precision=lax.Precision.HIGHEST)
    mean = y.mean(axis=(0, 2, 3), keepdims=True)
    var = y.var(axis=(0, 2, 3), keepdims=True)      # biased
    yhat = (y - mean) / jnp.sqrt(var + eps)
    return yhat * gamma.reshape(1, -1, 1, 1) + beta.reshape(1, -1, 1, 1)


# --------------------------------- main -------------------------------------

if __name__ == "__main__":
    # ChannelFixer(in_channels=4, out_channels=8, kernel_size=3, stride=1, padding=1)
    in_channels, out_channels = 4, 8
    kernel_size, stride, padding = 3, 1, 1
    batch, spatial = 2, 16

    key = jax.random.PRNGKey(0)
    kx, kw_, kg, kb = jax.random.split(key, 4)

    x = jax.random.normal(kx, (batch, in_channels, spatial, spatial), jnp.float32)

    fan_in = in_channels * kernel_size * kernel_size
    weight = jax.random.normal(
        kw_, (out_channels, in_channels, kernel_size, kernel_size), jnp.float32
    ) * (1.0 / jnp.sqrt(jnp.float32(fan_in)))
    gamma = 1.0 + 0.1 * jax.random.normal(kg, (out_channels,), jnp.float32)
    beta = 0.1 * jax.random.normal(kb, (out_channels,), jnp.float32)

    out = channel_fixer_forward(x, weight, gamma, beta,
                                stride=stride, padding=padding)
    out = jax.block_until_ready(out)

    ref = channel_fixer_reference(x, weight, gamma, beta, stride, padding)
    assert out.shape == (batch, out_channels, spatial, spatial), out.shape
    assert jnp.allclose(out, ref, atol=2e-3, rtol=2e-3), \
        float(jnp.max(jnp.abs(out - ref)))

    print("KERNEL_OK")
</pallas_src>

<mosaic_0001>
module attributes {stable_mosaic.version = 11 : i64} {
  func.func @conv_bn_stats_kernel(%arg0: i32, %arg1: i32, %arg2: memref<1x8x384xbf16, #tpu.memory_space<vmem>>, %arg3: memref<9x8x8xbf16, #tpu.memory_space<vmem>>, %arg4: memref<3x256xf32, #tpu.memory_space<vmem>>, %arg5: memref<1x256xf32, #tpu.memory_space<vmem>>, %arg6: memref<1x8x256xf32, #tpu.memory_space<vmem>>, %arg7: memref<1x1x8x1xf32, #tpu.memory_space<vmem>>, %arg8: memref<1x1x8x1xf32, #tpu.memory_space<vmem>>) attributes {dimension_semantics = [#tpu.dimension_semantics<parallel>, #tpu.dimension_semantics<parallel>], iteration_bounds = array<i64: 2, 1>, scalar_prefetch = 0 : i64, scratch_operands = 0 : i64, tpu.core_type = #tpu.core_type<tc>, window_params = [{transform_indices = @transform_0, window_bounds = array<i64: 1, 8, 384>}, {pipeline_mode = #tpu.pipeline_mode<synchronous>, transform_indices = @transform_1, window_bounds = array<i64: 9, 8, 8>}, {transform_indices = @transform_2, window_bounds = array<i64: 3, 256>}, {transform_indices = @transform_3, window_bounds = array<i64: 1, 256>}, {transform_indices = @transform_4, window_bounds = array<i64: 1, 8, 256>}, {transform_indices = @transform_5, window_bounds = array<i64: 1, 1, 8, 1>}, {transform_indices = @transform_6, window_bounds = array<i64: 1, 1, 8, 1>}]} {
    %cst = arith.constant 0.000000e+00 : f32
    %0 = vector.broadcast %cst : f32 to vector<8x256xf32>
    %c0 = arith.constant 0 : index
    %c0_0 = arith.constant 0 : index
    %c0_1 = arith.constant 0 : index
    %1 = vector.load %arg2[%c0, %c0_0, %c0_1] : memref<1x8x384xbf16, #tpu.memory_space<vmem>>, vector<1x8x256xbf16>
    %2 = vector.shape_cast %1 : vector<1x8x256xbf16> to vector<8x256xbf16>
    %c0_2 = arith.constant 0 : index
    %c0_3 = arith.constant 0 : index
    %c0_4 = arith.constant 0 : index
    %3 = vector.load %arg3[%c0_2, %c0_3, %c0_4] : memref<9x8x8xbf16, #tpu.memory_space<vmem>>, vector<1x8x8xbf16>
    %4 = vector.shape_cast %3 : vector<1x8x8xbf16> to vector<8x8xbf16>
    %cst_5 = arith.constant dense<0.000000e+00> : vector<8x256xf32>
    %5 = tpu.matmul %4, %2, %cst_5 {dimension_numbers = #tpu.dot_dimension_numbers<[1], [0], [0], [1], [0, 0, 1, 1], [], []>} : vector<8x8xbf16>, vector<8x256xbf16>, vector<8x256xf32> -> vector<8x256xf32>
    %c0_6 = arith.constant 0 : index
    %c0_7 = arith.constant 0 : index
    %6 = vector.load %arg4[%c0_6, %c0_7] : memref<3x256xf32, #tpu.memory_space<vmem>>, vector<1x256xf32>
    %7 = vector.broadcast %6 : vector<1x256xf32> to vector<8x256xf32>
    %8 = arith.mulf %5, %7 : vector<8x256xf32>
    %9 = arith.addf %0, %8 : vector<8x256xf32>
    %c0_8 = arith.constant 0 : index
    %c0_9 = arith.constant 0 : index
    %c1 = arith.constant 1 : index
    %10 = vector.load %arg2[%c0_8, %c0_9, %c1] : memref<1x8x384xbf16, #tpu.memory_space<vmem>>, vector<1x8x256xbf16>
    %11 = vector.shape_cast %10 : vector<1x8x256xbf16> to vector<8x256xbf16>
    %c1_10 = arith.constant 1 : index
    %c0_11 = arith.constant 0 : index
    %c0_12 = arith.constant 0 : index
    %12 = vector.load %arg3[%c1_10, %c0_11, %c0_12] : memref<9x8x8xbf16, #tpu.memory_space<vmem>>, vector<1x8x8xbf16>
    %13 = vector.shape_cast %12 : vector<1x8x8xbf16> to vector<8x8xbf16>
    %cst_13 = arith.constant dense<0.000000e+00> : vector<8x256xf32>
    %14 = tpu.matmul %13, %11, %cst_13 {dimension_numbers = #tpu.dot_dimension_numbers<[1], [0], [0], [1], [0, 0, 1, 1], [], []>} : vector<8x8xbf16>, vector<8x256xbf16>, vector<8x256xf32> -> vector<8x256xf32>
    %15 = arith.addf %9, %14 : vector<8x256xf32>
    %c0_14 = arith.constant 0 : index
    %c0_15 = arith.constant 0 : index
    %c2 = arith.constant 2 : index
    %16 = vector.load %arg2[%c0_14, %c0_15, %c2] : memref<1x8x384xbf16, #tpu.memory_space<vmem>>, vector<1x8x256xbf16>
    %17 = vector.shape_cast %16 : vector<1x8x256xbf16> to vector<8x256xbf16>
    %c2_16 = arith.constant 2 : index
    %c0_17 = arith.constant 0 : index
    %c0_18 = arith.constant 0 : index
    %18 = vector.load %arg3[%c2_16, %c0_17, %c0_18] : memref<9x8x8xbf16, #tpu.memory_space<vmem>>, vector<1x8x8xbf16>
    %19 = vector.shape_cast %18 : vector<1x8x8xbf16> to vector<8x8xbf16>
    %cst_19 = arith.constant dense<0.000000e+00> : vector<8x256xf32>
    %20 = tpu.matmul %19, %17, %cst_19 {dimension_numbers = #tpu.dot_dimension_numbers<[1], [0], [0], [1], [0, 0, 1, 1], [], []>} : vector<8x8xbf16>, vector<8x256xbf16>, vector<8x256xf32> -> vector<8x256xf32>
    %c2_20 = arith.constant 2 : index
    %c0_21 = arith.constant 0 : index
    %21 = vector.load %arg4[%c2_20, %c0_21] : memref<3x256xf32, #tpu.memory_space<vmem>>, vector<1x256xf32>
    %22 = vector.broadcast %21 : vector<1x256xf32> to vector<8x256xf32>
    %23 = arith.mulf %20, %22 : vector<8x256xf32>
    %24 = arith.addf %15, %23 : vector<8x256xf32>
    %c0_22 = arith.constant 0 : index
    %c0_23 = arith.constant 0 : index
    %c16 = arith.constant 16 : index
    %25 = vector.load %arg2[%c0_22, %c0_23, %c16] : memref<1x8x384xbf16, #tpu.memory_space<vmem>>, vector<1x8x256xbf16>
    %26 = vector.shape_cast %25 : vector<1x8x256xbf16> to vector<8x256xbf16>
    %c3 = arith.constant 3 : index
    %c0_24 = arith.constant 0 : index
    %c0_25 = arith.constant 0 : index
    %27 = vector.load %arg3[%c3, %c0_24, %c0_25] : memref<9x8x8xbf16, #tpu.memory_space<vmem>>, vector<1x8x8xbf16>
    %28 = vector.shape_cast %27 : vector<1x8x8xbf16> to vector<8x8xbf16>
    %cst_26 = arith.constant dense<0.000000e+00> : vector<8x256xf32>
    %29 = tpu.matmul %28, %26, %cst_26 {dimension_numbers = #tpu.dot_dimension_numbers<[1], [0], [0], [1], [0, 0, 1, 1], [], []>} : vector<8x8xbf16>, vector<8x256xbf16>, vector<8x256xf32> -> vector<8x256xf32>
    %c0_27 = arith.constant 0 : index
    %c0_28 = arith.constant 0 : index
    %30 = vector.load %arg4[%c0_27, %c0_28] : memref<3x256xf32, #tpu.memory_space<vmem>>, vector<1x256xf32>
    %31 = vector.broadcast %30 : vector<1x256xf32> to vector<8x256xf32>
    %32 = arith.mulf %29, %31 : vector<8x256xf32>
    %33 = arith.addf %24, %32 : vector<8x256xf32>
    %c0_29 = arith.constant 0 : index
    %c0_30 = arith.constant 0 : index
    %c17 = arith.constant 17 : index
    %34 = vector.load %arg2[%c0_29, %c0_30, %c17] : memref<1x8x384xbf16, #tpu.memory_space<vmem>>, vector<1x8x256xbf16>
    %35 = vector.shape_cast %34 : vector<1x8x256xbf16> to vector<8x256xbf16>
    %c4 = arith.constant 4 : index
    %c0_31 = arith.constant 0 : index
    %c0_32 = arith.constant 0 : index
    %36 = vector.load %arg3[%c4, %c0_31, %c0_32] : memref<9x8x8xbf16, #tpu.memory_space<vmem>>, vector<1x8x8xbf16>
    %37 = vector.shape_cast %36 : vector<1x8x8xbf16> to vector<8x8xbf16>
    %cst_33 = arith.constant dense<0.000000e+00> : vector<8x256xf32>
    %38 = tpu.matmul %37, %35, %cst_33 {dimension_numbers = #tpu.dot_dimension_numbers<[1], [0], [0], [1], [0, 0, 1, 1], [], []>} : vector<8x8xbf16>, vector<8x256xbf16>, vector<8x256xf32> -> vector<8x256xf32>
    %39 = arith.addf %33, %38 : vector<8x256xf32>
    %c0_34 = arith.constant 0 : index
    %c0_35 = arith.constant 0 : index
    %c18 = arith.constant 18 : index
    %40 = vector.load %arg2[%c0_34, %c0_35, %c18] : memref<1x8x384xbf16, #tpu.memory_space<vmem>>, vector<1x8x256xbf16>
    %41 = vector.shape_cast %40 : vector<1x8x256xbf16> to vector<8x256xbf16>
    %c5 = arith.constant 5 : index
    %c0_36 = arith.constant 0 : index
    %c0_37 = arith.constant 0 : index
    %42 = vector.load %arg3[%c5, %c0_36, %c0_37] : memref<9x8x8xbf16, #tpu.memory_space<vmem>>, vector<1x8x8xbf16>
    %43 = vector.shape_cast %42 : vector<1x8x8xbf16> to vector<8x8xbf16>
    %cst_38 = arith.constant dense<0.000000e+00> : vector<8x256xf32>
    %44 = tpu.matmul %43, %41, %cst_38 {dimension_numbers = #tpu.dot_dimension_numbers<[1], [0], [0], [1], [0, 0, 1, 1], [], []>} : vector<8x8xbf16>, vector<8x256xbf16>, vector<8x256xf32> -> vector<8x256xf32>
    %c2_39 = arith.constant 2 : index
    %c0_40 = arith.constant 0 : index
    %45 = vector.load %arg4[%c2_39, %c0_40] : memref<3x256xf32, #tpu.memory_space<vmem>>, vector<1x256xf32>
    %46 = vector.broadcast %45 : vector<1x256xf32> to vector<8x256xf32>
    %47 = arith.mulf %44, %46 : vector<8x256xf32>
    %48 = arith.addf %39, %47 : vector<8x256xf32>
    %c0_41 = arith.constant 0 : index
    %c0_42 = arith.constant 0 : index
    %c32 = arith.constant 32 : index
    %49 = vector.load %arg2[%c0_41, %c0_42, %c32] : memref<1x8x384xbf16, #tpu.memory_space<vmem>>, vector<1x8x256xbf16>
    %50 = vector.shape_cast %49 : vector<1x8x256xbf16> to vector<8x256xbf16>
    %c6 = arith.constant 6 : index
    %c0_43 = arith.constant 0 : index
    %c0_44 = arith.constant 0 : index
    %51 = vector.load %arg3[%c6, %c0_43, %c0_44] : memref<9x8x8xbf16, #tpu.memory_space<vmem>>, vector<1x8x8xbf16>
    %52 = vector.shape_cast %51 : vector<1x8x8xbf16> to vector<8x8xbf16>
    %cst_45 = arith.constant dense<0.000000e+00> : vector<8x256xf32>
    %53 = tpu.matmul %52, %50, %cst_45 {dimension_numbers = #tpu.dot_dimension_numbers<[1], [0], [0], [1], [0, 0, 1, 1], [], []>} : vector<8x8xbf16>, vector<8x256xbf16>, vector<8x256xf32> -> vector<8x256xf32>
    %c0_46 = arith.constant 0 : index
    %c0_47 = arith.constant 0 : index
    %54 = vector.load %arg4[%c0_46, %c0_47] : memref<3x256xf32, #tpu.memory_space<vmem>>, vector<1x256xf32>
    %55 = vector.broadcast %54 : vector<1x256xf32> to vector<8x256xf32>
    %56 = arith.mulf %53, %55 : vector<8x256xf32>
    %57 = arith.addf %48, %56 : vector<8x256xf32>
    %c0_48 = arith.constant 0 : index
    %c0_49 = arith.constant 0 : index
    %c33 = arith.constant 33 : index
    %58 = vector.load %arg2[%c0_48, %c0_49, %c33] : memref<1x8x384xbf16, #tpu.memory_space<vmem>>, vector<1x8x256xbf16>
    %59 = vector.shape_cast %58 : vector<1x8x256xbf16> to vector<8x256xbf16>
    %c7 = arith.constant 7 : index
    %c0_50 = arith.constant 0 : index
    %c0_51 = arith.constant 0 : index
    %60 = vector.load %arg3[%c7, %c0_50, %c0_51] : memref<9x8x8xbf16, #tpu.memory_space<vmem>>, vector<1x8x8xbf16>
    %61 = vector.shape_cast %60 : vector<1x8x8xbf16> to vector<8x8xbf16>
    %cst_52 = arith.constant dense<0.000000e+00> : vector<8x256xf32>
    %62 = tpu.matmul %61, %59, %cst_52 {dimension_numbers = #tpu.dot_dimension_numbers<[1], [0], [0], [1], [0, 0, 1, 1], [], []>} : vector<8x8xbf16>, vector<8x256xbf16>, vector<8x256xf32> -> vector<8x256xf32>
    %63 = arith.addf %57, %62 : vector<8x256xf32>
    %c0_53 = arith.constant 0 : index
    %c0_54 = arith.constant 0 : index
    %c34 = arith.constant 34 : index
    %64 = vector.load %arg2[%c0_53, %c0_54, %c34] : memref<1x8x384xbf16, #tpu.memory_space<vmem>>, vector<1x8x256xbf16>
    %65 = vector.shape_cast %64 : vector<1x8x256xbf16> to vector<8x256xbf16>
    %c8 = arith.constant 8 : index
    %c0_55 = arith.constant 0 : index
    %c0_56 = arith.constant 0 : index
    %66 = vector.load %arg3[%c8, %c0_55, %c0_56] : memref<9x8x8xbf16, #tpu.memory_space<vmem>>, vector<1x8x8xbf16>
    %67 = vector.shape_cast %66 : vector<1x8x8xbf16> to vector<8x8xbf16>
    %cst_57 = arith.constant dense<0.000000e+00> : vector<8x256xf32>
    %68 = tpu.matmul %67, %65, %cst_57 {dimension_numbers = #tpu.dot_dimension_numbers<[1], [0], [0], [1], [0, 0, 1, 1], [], []>} : vector<8x8xbf16>, vector<8x256xbf16>, vector<8x256xf32> -> vector<8x256xf32>
    %c2_58 = arith.constant 2 : index
    %c0_59 = arith.constant 0 : index
    %69 = vector.load %arg4[%c2_58, %c0_59] : memref<3x256xf32, #tpu.memory_space<vmem>>, vector<1x256xf32>
    %70 = vector.broadcast %69 : vector<1x256xf32> to vector<8x256xf32>
    %71 = arith.mulf %68, %70 : vector<8x256xf32>
    %72 = arith.addf %63, %71 : vector<8x256xf32>
    %c0_60 = arith.constant 0 : index
    %c0_61 = arith.constant 0 : index
    %73 = vector.load %arg5[%c0_60, %c0_61] : memref<1x256xf32, #tpu.memory_space<vmem>>, vector<1x256xf32>
    %cst_62 = arith.constant dense<0.000000e+00> : vector<1xf32>
    %74 = vector.multi_reduction <add>, %73, %cst_62 [1] : vector<1x256xf32> to vector<1xf32>
    %75 = vector.shape_cast %74 : vector<1xf32> to vector<1x1xf32>
    %76 = vector.broadcast %73 : vector<1x256xf32> to vector<8x256xf32>
    %77 = arith.mulf %72, %76 : vector<8x256xf32>
    %cst_63 = arith.constant dense<0.000000e+00> : vector<8xf32>
    %78 = vector.multi_reduction <add>, %77, %cst_63 [1] : vector<8x256xf32> to vector<8xf32>
    %79 = vector.shape_cast %78 : vector<8xf32> to vector<8x1xf32>
    %cst_64 = arith.constant 1.000000e+00 : f32
    %80 = vector.broadcast %cst_64 : f32 to vector<1x1xf32>
    %81 = arith.maximumf %75, %80 : vector<1x1xf32>
    %82 = vector.broadcast %81 : vector<1x1xf32> to vector<8x1xf32>
    %83 = arith.divf %79, %82 : vector<8x1xf32>
    %84 = vector.broadcast %83 : vector<8x1xf32> to vector<8x256xf32>
    %85 = arith.subf %72, %84 : vector<8x256xf32>
    %86 = vector.broadcast %73 : vector<1x256xf32> to vector<8x256xf32>
    %87 = arith.mulf %85, %86 : vector<8x256xf32>
    %c0_65 = arith.constant 0 : index
    %c0_66 = arith.constant 0 : index
    %c0_67 = arith.constant 0 : index
    %c0_68 = arith.constant 0 : index
    %88 = vector.load %arg7[%c0_65, %c0_66, %c0_67, %c0_68] : memref<1x1x8x1xf32, #tpu.memory_space<vmem>>, vector<1x1x8x1xf32>
    %89 = vector.shape_cast %88 : vector<1x1x8x1xf32> to vector<8x1xf32>
    %90 = vector.shape_cast %79 : vector<8x1xf32> to vector<1x1x8x1xf32>
    tpu.vector_store %arg7[%c0_65, %c0_66, %c0_67, %c0_68], %90 {strides = array<i32>} : memref<1x1x8x1xf32, #tpu.memory_space<vmem>>, vector<1x1x8x1xf32>,
    %91 = arith.mulf %87, %87 : vector<8x256xf32>
    %cst_69 = arith.constant dense<0.000000e+00> : vector<8xf32>
    %92 = vector.multi_reduction <add>, %91, %cst_69 [1] : vector<8x256xf32> to vector<8xf32>
    %93 = vector.shape_cast %92 : vector<8xf32> to vector<8x1xf32>
    %c0_70 = arith.constant 0 : index
    %c0_71 = arith.constant 0 : index
    %c0_72 = arith.constant 0 : index
    %c0_73 = arith.constant 0 : index
    %94 = vector.load %arg8[%c0_70, %c0_71, %c0_72, %c0_73] : memref<1x1x8x1xf32, #tpu.memory_space<vmem>>, vector<1x1x8x1xf32>
    %95 = vector.shape_cast %94 : vector<1x1x8x1xf32> to vector<8x1xf32>
    %96 = vector.shape_cast %93 : vector<8x1xf32> to vector<1x1x8x1xf32>
    tpu.vector_store %arg8[%c0_70, %c0_71, %c0_72, %c0_73], %96 {strides = array<i32>} : memref<1x1x8x1xf32, #tpu.memory_space<vmem>>, vector<1x1x8x1xf32>,
    %c0_74 = arith.constant 0 : index
    %c0_75 = arith.constant 0 : index
    %c0_76 = arith.constant 0 : index
    %97 = vector.load %arg6[%c0_74, %c0_75, %c0_76] : memref<1x8x256xf32, #tpu.memory_space<vmem>>, vector<1x8x256xf32>
    %98 = vector.shape_cast %97 : vector<1x8x256xf32> to vector<8x256xf32>
    %99 = vector.shape_cast %72 : vector<8x256xf32> to vector<1x8x256xf32>
    tpu.vector_store %arg6[%c0_74, %c0_75, %c0_76], %99 {strides = array<i32>} : memref<1x8x256xf32, #tpu.memory_space<vmem>>, vector<1x8x256xf32>,
    return
  }
  func.func @transform_0(%arg0: i32, %arg1: i32) -> (i32, i32, i32) {
    %c0_i32 = arith.constant 0 : i32
    %c0_i32_0 = arith.constant 0 : i32
    %c0_i32_1 = arith.constant 0 : i32
    return %arg0, %c0_i32, %c0_i32_0 : i32, i32, i32
  }
  func.func @transform_1(%arg0: i32, %arg1: i32) -> (i32, i32, i32) {
    %c0_i32 = arith.constant 0 : i32
    %c0_i32_0 = arith.constant 0 : i32
    %c0_i32_1 = arith.constant 0 : i32
    %c0_i32_2 = arith.constant 0 : i32
    return %c0_i32, %c0_i32_0, %c0_i32_1 : i32, i32, i32
  }
  func.func @transform_2(%arg0: i32, %arg1: i32) -> (i32, i32) {
    %c0_i32 = arith.constant 0 : i32
    %c0_i32_0 = arith.constant 0 : i32
    return %c0_i32, %arg1 : i32, i32
  }
  func.func @transform_3(%arg0: i32, %arg1: i32) -> (i32, i32) {
    %c0_i32 = arith.constant 0 : i32
    %c0_i32_0 = arith.constant 0 : i32
    return %c0_i32, %arg1 : i32, i32
  }
  func.func @transform_4(%arg0: i32, %arg1: i32) -> (i32, i32, i32) {
    %c0_i32 = arith.constant 0 : i32
    %c0_i32_0 = arith.constant 0 : i32
    return %arg0, %c0_i32, %arg1 : i32, i32, i32
  }
  func.func @transform_5(%arg0: i32, %arg1: i32) -> (i32, i32, i32, i32) {
    %c0_i32 = arith.constant 0 : i32
    %c0_i32_0 = arith.constant 0 : i32
    %c0_i32_1 = arith.constant 0 : i32
    return %arg0, %arg1, %c0_i32, %c0_i32_0 : i32, i32, i32, i32
  }
  func.func @transform_6(%arg0: i32, %arg1: i32) -> (i32, i32, i32, i32) {
    %c0_i32 = arith.constant 0 : i32
    %c0_i32_0 = arith.constant 0 : i32
    %c0_i32_1 = arith.constant 0 : i32
    return %arg0, %arg1, %c0_i32, %c0_i32_0 : i32, i32, i32, i32
  }
}

module attributes {stable_mosaic.version = 11 : i64} {
  func.func @bn_apply_kernel(%arg0: i32, %arg1: memref<1x8x256xf32, #tpu.memory_space<vmem>>, %arg2: memref<8x1xf32, #tpu.memory_space<vmem>>, %arg3: memref<8x1xf32, #tpu.memory_space<vmem>>, %arg4: memref<1x8x256xf32, #tpu.memory_space<vmem>>) attributes {dimension_semantics = [#tpu.dimension_semantics<parallel>], iteration_bounds = array<i64: 2>, scalar_prefetch = 0 : i64, scratch_operands = 0 : i64, tpu.core_type = #tpu.core_type<tc>, window_params = [{transform_indices = @transform_0, window_bounds = array<i64: 1, 8, 256>}, {pipeline_mode = #tpu.pipeline_mode<synchronous>, transform_indices = @transform_1, window_bounds = array<i64: 8, 1>}, {pipeline_mode = #tpu.pipeline_mode<synchronous>, transform_indices = @transform_2, window_bounds = array<i64: 8, 1>}, {transform_indices = @transform_3, window_bounds = array<i64: 1, 8, 256>}]} {
    %c0 = arith.constant 0 : index
    %c0_0 = arith.constant 0 : index
    %c0_1 = arith.constant 0 : index
    %0 = vector.load %arg1[%c0, %c0_0, %c0_1] : memref<1x8x256xf32, #tpu.memory_space<vmem>>, vector<1x8x256xf32>
    %1 = vector.shape_cast %0 : vector<1x8x256xf32> to vector<8x256xf32>
    %c0_2 = arith.constant 0 : index
    %c0_3 = arith.constant 0 : index
    %2 = vector.load %arg2[%c0_2, %c0_3] : memref<8x1xf32, #tpu.memory_space<vmem>>, vector<8x1xf32>
    %3 = vector.broadcast %2 : vector<8x1xf32> to vector<8x256xf32>
    %4 = arith.mulf %1, %3 : vector<8x256xf32>
    %c0_4 = arith.constant 0 : index
    %c0_5 = arith.constant 0 : index
    %5 = vector.load %arg3[%c0_4, %c0_5] : memref<8x1xf32, #tpu.memory_space<vmem>>, vector<8x1xf32>
    %6 = vector.broadcast %5 : vector<8x1xf32> to vector<8x256xf32>
    %7 = arith.addf %4, %6 : vector<8x256xf32>
    %c0_6 = arith.constant 0 : index
    %c0_7 = arith.constant 0 : index
    %c0_8 = arith.constant 0 : index
    %8 = vector.load %arg4[%c0_6, %c0_7, %c0_8] : memref<1x8x256xf32, #tpu.memory_space<vmem>>, vector<1x8x256xf32>
    %9 = vector.shape_cast %8 : vector<1x8x256xf32> to vector<8x256xf32>
    %10 = vector.shape_cast %7 : vector<8x256xf32> to vector<1x8x256xf32>
    tpu.vector_store %arg4[%c0_6, %c0_7, %c0_8], %10 {strides = array<i32>} : memref<1x8x256xf32, #tpu.memory_space<vmem>>, vector<1x8x256xf32>,
    return
  }
  func.func @transform_0(%arg0: i32) -> (i32, i32, i32) {
    %c0_i32 = arith.constant 0 : i32
    %c0_i32_0 = arith.constant 0 : i32
    %c0_i32_1 = arith.constant 0 : i32
    return %arg0, %c0_i32, %c0_i32_0 : i32, i32, i32
  }
  func.func @transform_1(%arg0: i32) -> (i32, i32) {
    %c0_i32 = arith.constant 0 : i32
    %c0_i32_0 = arith.constant 0 : i32
    %c0_i32_1 = arith.constant 0 : i32
    return %c0_i32, %c0_i32_0 : i32, i32
  }
  func.func @transform_2(%arg0: i32) -> (i32, i32) {
    %c0_i32 = arith.constant 0 : i32
    %c0_i32_0 = arith.constant 0 : i32
    %c0_i32_1 = arith.constant 0 : i32
    return %c0_i32, %c0_i32_0 : i32, i32
  }
  func.func @transform_3(%arg0: i32) -> (i32, i32, i32) {
    %c0_i32 = arith.constant 0 : i32
    %c0_i32_0 = arith.constant 0 : i32
    %c0_i32_1 = arith.constant 0 : i32
    return %arg0, %c0_i32, %c0_i32_0 : i32, i32, i32
  }
}

</mosaic_0001>

<bundles_post_ra>
// kernel: channel_fixer_forward.3
= control target key start
LH: loop header
LB: loop body
LE: loop exit
PB: predicated region body
PF: predicated region fallthrough
CT: control target
= control target key end

     0   :  { %s298_s12 = smov 0   ;;  %s321_s0 = inlined_call_operand.vmem [shape: f32[2,8,256], index: 0, kind: input, shape index: {}]   ;;  %s322_s1 = inlined_call_operand.vmem [shape: f32[8,1], index: 1, kind: input, shape index: {}]   ;;  %s323_s2 = inlined_call_operand.vmem [shape: f32[8,1], index: 2, kind: input, shape index: {}]   ;;  %s324_s3 = inlined_call_operand.vmem [shape: f32[2,8,256], index: 3, kind: output, shape index: {}]  }
   0x1 LB: > { %s246_s13 = sadd.s32 4294967295, %s275_s12   ;;  %p250_p0 = scmp.ge.s32.totalorder %s275_s12, 1  ;;  %s275_s12 = sphi %s298_s12, %s13_s12  }
   0x2   : > { %p137_p1 = scmp.lt.s32.totalorder %s275_s12, 3 }
   0x4   : > { %p138_p2 = pnand %p250_p0, %p137_p1 }
   0x5   : > { %v173_v0 = vld [vmem:[%s322_s1] sm:$0xff] (!%p138_p2)  ;;  %v277_v1 = vmov (!%p138_p2), 0   ;;  %p161_p3 = scmp.lt.s32.totalorder (!%p138_p2), %s246_s13, 1 }
   0x6   : > { %141 = sbr.rel (%p138_p2) target bundleno = 142 (0x8e), region = 32  ;;  %268 = vset.pattern.permute.xlu0 (!%p138_p2), %v277_v1  ;;  %v181_v2 = vld [vmem:[%s323_s2] sm:$0xff] (!%p138_p2) }
   0x7   : > { %176 = vperm.xlu0 (!%p138_p2), %268, %v173_v0  }
   0xb   : > { %184 = vperm.xlu0 (!%p138_p2), %268, %v181_v2  }
   0xd   : > { %s326_s13 = smov (!%p161_p3, %s246_s13), 1 }
   0xe   : > { %s257_s18 = sshll.u32 %s326_s13, 4 }
   0xf   : > { %s165_s21 = scalar_lea.vmem %s321_s0, %s257_s18  ;;  %s170_s24 = scalar_lea.vmem %s324_s3, %s257_s18 }
  0x10   : > { %v171_v4 = vld [vmem:[%s165_s21] sm:$0xff]  ;;  %v172_v5 = vld [vmem:[%s165_s21 + $0x8] sm:$0xff] }
  0x86   : > { %v177_v3 = vpop.permute.xlu0 %176 }
  0x87   : > { %v179_v6 = vmul.f32 %v177_v3, %v171_v4  ;;  %v180_v7 = vmul.f32 %v177_v3, %v172_v5 }
  0x8a   : > { %v185_v8 = vpop.permute.xlu0 %184 }
  0x8b   : > { %v187_v9 = vadd.f32 %v185_v8, %v179_v6  ;;  %v188_v10 = vadd.f32 %v185_v8, %v180_v7 }
  0x8d   : > { %189 = vst [vmem:[%s170_s24] sm:$0xff] %v187_v9  ;;  %190 = vst [vmem:[%s170_s24 + $0x8] sm:$0xff] %v188_v10 }
  0x8e PF: > { %s13_s12 = sadd.s32 1, %s275_s12  }
  0x8f   : > { %p10_p4 = scmp.ge.s32.totalorder %s13_s12, 4  }
  0x91   :  { %12 = sbr.rel (!%p10_p4) target bundleno = 1 (0x1), region = 62 }

// kernel: channel_fixer_forward.2
= control target key start
LH: loop header
LB: loop body
LE: loop exit
PB: predicated region body
PF: predicated region fallthrough
CT: control target
= control target key end

     0   :  { %s1354_s21 = smov 0   ;;  %s1356_s22 = smov 0   ;;  %s1486_s0 = inlined_call_operand.vmem [shape: bf16[2,8,384], index: 0, kind: input, shape index: {}]   ;;  %s1487_s1 = inlined_call_operand.vmem [shape: bf16[9,8,8], index: 1, kind: input, shape index: {}]   ;;  %s1488_s2 = inlined_call_operand.vmem [shape: f32[3,256], index: 2, kind: input, shape index: {}]   ;;  %s1489_s3 = inlined_call_operand.vmem [shape: f32[1,256], index: 3, kind: input, shape index: {}]   ;;  %s1490_s4 = inlined_call_operand.vmem [shape: f32[2,8,256], index: 4, kind: output, shape index: {0}]   ;;  %s1491_s5 = inlined_call_operand.vmem [shape: f32[2,1,8,1], index: 5, kind: output, shape index: {1}]   ;;  %s1492_s6 = inlined_call_operand.vmem [shape: f32[2,1,8,1], index: 6, kind: output, shape index: {2}]  }
   0x1   :  { %s1358_s23 = smov 0  }
   0x2 LB: > { %s29_s24 = sadd.s32 1, %s1304_s22  ;;  %p1206_p0 = scmp.ge.s32.totalorder %s1308_s23, 1  ;;  %s1308_s23 = sphi %s1358_s23, %s17_s23   ;;  %s1304_s22 = sphi %s1356_s22, %s1494_s22   ;;  %s1300_s21 = sphi %s1354_s21, %s1493_s21  }
   0x3   : > { %p31_p1 = scmp.ge.s32.totalorder %s29_s24, 2  ;;  %p256_p2 = scmp.lt.s32.totalorder %s1308_s23, 3 }
   0x5   : > { %s1496_s24 = smov (%p31_p1, %s29_s24), 0  ;;  %p257_p3 = pnand %p1206_p0, %p256_p2 }
   0x6   : > { %p313_p4 = scmp.lt.s32.totalorder (!%p257_p3), %s1300_s21, 1  ;;  %v1310_v0 = vmov (!%p257_p3), 0   ;;  %vm365_vm0 = vcmask (!%p257_p3), 1043456   ;;  %s1311_s29 = smov (!%p257_p3), 127   ;;  %v355_v6 = vld [vmem:[%s1487_s1] sm:$0xf] (!%p257_p3) }
   0x7   : > { %260 = sbr.rel (%p257_p3) target bundleno = 701 (0x2bd), region = 36  ;;  %404 = vmatprep.mubr.bf16.mxu0 (!%p257_p3), %v1310_v0  ;;  %491 = vmatprep.mubr.bf16.mxu1 (!%p257_p3), %v1310_v0  ;;  %vm361_vm1 = vcmask (!%p257_p3), 64512   ;;  %s1312_s8 = smov (!%p257_p3), 126   ;;  %vm447_vm2 = vcmask (!%p257_p3), 1039360   ;;  %vm510_vm3 = vcmask (!%p257_p3), 1031168   ;;  %vm588_vm4 = vcmask (!%p257_p3), 916480  }
   0x8   : > { %s1313_s9 = smov (!%p257_p3), 112   ;;  %s1314_s10 = smov (!%p257_p3), 111   ;;  %v1216_v15 = vld [vmem:[%s1487_s1 + $0x4] sm:$0xf] (!%p257_p3)  ;;  %v1222_v21 = vld [vmem:[%s1487_s1 + $0x8] sm:$0xf] (!%p257_p3) }
   0x9   : > { %s1315_s11 = smov (!%p257_p3), 110   ;;  %s1316_s12 = smov (!%p257_p3), 96   ;;  %vm653_vm5 = vcmask (!%p257_p3), 908288   ;;  %v1226_v29 = vld [vmem:[%s1487_s1 + $0xc] sm:$0xf] (!%p257_p3)  ;;  %vm716_vm6 = vcmask (!%p257_p3), 900096  }
   0xa   : > { %s1317_s13 = smov (!%p257_p3), 95   ;;  %s1318_s14 = smov (!%p257_p3), 94   ;;  %v1229_v35 = vld [vmem:[%s1487_s1 + $0x10] sm:$0xf] (!%p257_p3)  ;;  %vm781_vm7 = vcmask (!%p257_p3), 785408   ;;  %vm846_vm8 = vcmask (!%p257_p3), 777216  }
   0xb   : > { %v1232_v43 = vld [vmem:[%s1487_s1 + $0x14] sm:$0xf] (!%p257_p3)  ;;  %v1235_v49 = vld [vmem:[%s1487_s1 + $0x18] sm:$0xf] (!%p257_p3)  ;;  %vm909_vm9 = vcmask (!%p257_p3), 769024   ;;  %vm978_vm10 = vcmask (!%p257_p3), 1040384  }
   0xc   : > { %v1238_v57 = vld [vmem:[%s1487_s1 + $0x1c] sm:$0xf] (!%p257_p3)  ;;  %v1241_v62 = vld [vmem:[%s1487_s1 + $0x20] sm:$0xf] (!%p257_p3)  ;;  %vm1000_vm11 = vcmask (!%p257_p3), 7168  }
   0xe   : > { %s1498_s21 = smov (!%p313_p4, %s1300_s21), 1 }
   0xf   : > { %s1247_s25 = smul.u32 12, %s1498_s21  ;;  %s1246_s17 = sshll.u32 %s1498_s21, 4 }
  0x10   : > { %s337_s20 = scalar_lea.vmem %s1490_s4, %s1246_s17 }
  0x11   : > { %s317_s28 = scalar_lea.vmem %s1486_s0, %s1247_s25  ;;  %s1210_s25 = sshll.u32 %s1498_s21, 3 }
  0x12   : > { %v1281_v1 = vld [vmem:[%s317_s28 + $0x8] ss:$0 sps:$4 sm:$0xff]   ;;  %v429_v2 = vld [vmem:[%s317_s28] sm:$0xff]  ;;  %s345_s28 = scalar_lea.vmem %s1491_s5, %s1210_s25  ;;  %s352_s30 = scalar_lea.vmem %s1492_s6, %s1210_s25 }
  0x13   : > { %v1217_v3 = vcombine.low %v429_v2, %v429_v2  ;;  %v1218_v4 = vcombine.high %v429_v2, %v429_v2  ;;  %445 = vrot.lane.b32.xlu1 %v1281_v1, %s1311_s29 }
  0x15   : > { %441 = vrot.lane.b32.xlu0 %v1217_v3, %s1311_s29  ;;  %1214 = vmatprep.subr.msk.bf16.mxu0 %vm365_vm0, %v1218_v4  ;;  %v367_v5 = vsel %vm365_vm0, %v1217_v3, 0 }
  0x16   : > { %373 = vmatpush1.bf16.msra.mxu0 %v367_v5 }
  0x17   : > { %504 = vrot.lane.b32.xlu1 %v1217_v3, %s1312_s8 }
  0x19   : > { %443 = vrot.lane.b32.xlu0 %v1218_v4, %s1311_s29  ;;  %1215 = vmatmul.mubr.msk.bf16.vlgmr.msra.gmra.mrb[0].mxu0 %vm361_vm1, %v355_v6 }
  0x1a   : > { %554 = vmatprep.mubr.bf16.mxu0 %v1310_v0 }
  0x1b   : > { %508 = vrot.lane.b32.xlu1 %v1281_v1, %s1312_s8 }
  0x1d   : > { %506 = vrot.lane.b32.xlu0 %v1218_v4, %s1312_s8 }
  0x1f   : > { %584 = vrot.lane.b32.xlu1 %v1218_v4, %s1313_s9 }
  0x21   : > { %582 = vrot.lane.b32.xlu0 %v1217_v3, %s1313_s9 }
  0x23   : > { %647 = vrot.lane.b32.xlu1 %v1217_v3, %s1314_s10 }
  0x25   : > { %586 = vrot.lane.b32.xlu0 %v1281_v1, %s1313_s9 }
  0x27   : > { %651 = vrot.lane.b32.xlu1 %v1281_v1, %s1314_s10 }
  0x29   : > { %649 = vrot.lane.b32.xlu0 %v1218_v4, %s1314_s10 }
  0x2b   : > { %712 = vrot.lane.b32.xlu1 %v1218_v4, %s1315_s11 }
  0x2d   : > { %710 = vrot.lane.b32.xlu0 %v1217_v3, %s1315_s11 }
  0x2f   : > { %775 = vrot.lane.b32.xlu1 %v1217_v3, %s1316_s12 }
  0x31   : > { %714 = vrot.lane.b32.xlu0 %v1281_v1, %s1315_s11 }
  0x33   : > { %779 = vrot.lane.b32.xlu1 %v1281_v1, %s1316_s12 }
  0x35   : > { %777 = vrot.lane.b32.xlu0 %v1218_v4, %s1316_s12 }
  0x37   : > { %842 = vrot.lane.b32.xlu1 %v1218_v4, %s1317_s13 }
  0x39   : > { %840 = vrot.lane.b32.xlu0 %v1217_v3, %s1317_s13 }
  0x3b   : > { %903 = vrot.lane.b32.xlu1 %v1217_v3, %s1318_s14  ;;  %v415_v3 = vlaneseq }
  0x3d   : > { %844 = vrot.lane.b32.xlu0 %v1281_v1, %s1317_s13 }
  0x3f   : > { %907 = vrot.lane.b32.xlu1 %v1281_v1, %s1318_s14 }
  0x41   : > { %905 = vrot.lane.b32.xlu0 %v1218_v4, %s1318_s14  ;;  %v416_v4 = vshrl.u32 %v415_v3, 7 }
  0x43   : > { %v1441_v5 = vsub.s32 0, %v416_v4  ;;  %v421_v6 = vsub.s32 1, %v416_v4 }
  0x85   : > { %v446_v7 = vpop.permute.xlu1 %445 }
  0x87   : > { %v442_v8 = vpop.permute.xlu0 %441 }
  0x89   : > { %v505_v9 = vpop.permute.xlu1 %504 }
  0x8b   : > { %v444_v10 = vpop.permute.xlu0 %443 }
  0x8c   : > { %v449_v11 = vsel %vm447_vm2, %v444_v10, %v446_v7  ;;  %v448_v12 = vsel %vm447_vm2, %v442_v8, %v444_v10  ;;  %v966_v7 = vld [vmem:[%s1489_s3] sm:$0x3] }
  0x8d   : > { %1220 = vmatprep.subr.msk.bf16.mxu1 %vm365_vm0, %v449_v11  ;;  %v454_v13 = vsel %vm365_vm0, %v448_v12, 0  ;;  %v509_v14 = vpop.permute.xlu1 %508  ;;  %v1447_v8 = vrot.slane %v966_v7, %v1441_v5 }
  0x8e   : > { %460 = vmatpush1.bf16.msra.mxu1 %v454_v13  ;;  %v413_v13 = vld [vmem:[%s1488_s2] ss:$4 sm:$0x3] }
  0x8f   : > { %v507_v16 = vpop.permute.xlu0 %506  ;;  %v979_v10 = vsel %vm978_vm10, %v1447_v8, 0.0 }
  0x90   : > { %v511_v17 = vsel %vm510_vm3, %v505_v9, %v507_v16  ;;  %v512_v18 = vsel %vm510_vm3, %v507_v16, %v509_v14  ;;  %v1449_v9 = vrot.slane %v966_v7, %v421_v6  ;;  %v418_v14 = vrot.slane %v413_v13, %v1441_v5 }
  0x91   : > { %v517_v19 = vsel %vm365_vm0, %v511_v17, 0  ;;  %1223 = vmatprep.subr.msk.bf16.mxu0 %vm365_vm0, %v512_v18  ;;  %1221 = vmatmul.mubr.msk.bf16.vlgmr.msra.gmra.mrb[0].mxu1 %vm361_vm1, %v1216_v15  ;;  %v585_v20 = vpop.permute.xlu1 %584  ;;  %v422_v15 = vrot.slane %v413_v13, %v421_v6  ;;  %v1225_v18 = vld [vmem:[%s1488_s2 + $0x2] ss:$4 sm:$0x3] }
  0x92   : > { %523 = vmatpush1.bf16.msra.mxu0 %v517_v19  ;;  %632 = vmatprep.mubr.bf16.mxu1 %v1310_v0  ;;  %v980_v11 = vsel %vm978_vm10, %v1449_v9, 0.0 }
  0x93   : > { %v583_v22 = vpop.permute.xlu0 %582  ;;  %v981_v12 = vadd.f32 %v980_v11, %v979_v10 }
  0x94   : > { %v589_v23 = vsel %vm588_vm4, %v583_v22, %v585_v20  ;;  %v569_v22 = vrot.slane %v1225_v18, %v1441_v5 }
  0x95   : > { %1224 = vmatmul.mubr.msk.bf16.vlgmr.msra.gmra.mrb[4].mxu0 %vm361_vm1, %v1222_v21  ;;  %v648_v24 = vpop.permute.xlu1 %647  ;;  %v595_v27 = vsel %vm365_vm0, %v589_v23, 0  ;;  %982 = vadd.xlane.f32.xlu0 %v981_v12 }
  0x96   : > { %697 = vmatprep.mubr.bf16.mxu0 %v1310_v0 }
  0x97   : > { %v587_v25 = vpop.permute.xlu0 %586 }
  0x98   : > { %v590_v26 = vsel %vm588_vm4, %v585_v20, %v587_v25  ;;  %v573_v25 = vrot.slane %v1225_v18, %v421_v6 }
  0x99   : > { %1227 = vmatprep.subr.msk.bf16.mxu1 %vm365_vm0, %v590_v26  ;;  %v652_v28 = vpop.permute.xlu1 %651 }
  0x9a   : > { %601 = vmatpush1.bf16.msra.mxu1 %v595_v27 }
  0x9b   : > { %v650_v30 = vpop.permute.xlu0 %649 }
  0x9c   : > { %v654_v31 = vsel %vm653_vm5, %v648_v24, %v650_v30  ;;  %v655_v32 = vsel %vm653_vm5, %v650_v30, %v652_v28 }
  0x9d   : > { %v660_v33 = vsel %vm365_vm0, %v654_v31, 0  ;;  %1230 = vmatprep.subr.msk.bf16.mxu0 %vm365_vm0, %v655_v32  ;;  %1228 = vmatmul.mubr.msk.bf16.vlgmr.msra.gmra.mrb[4].mxu1 %vm361_vm1, %v1226_v29  ;;  %v713_v34 = vpop.permute.xlu1 %712 }
  0x9e   : > { %666 = vmatpush1.bf16.msra.mxu0 %v660_v33  ;;  %760 = vmatprep.mubr.bf16.mxu1 %v1310_v0 }
  0x9f   : > { %v711_v36 = vpop.permute.xlu0 %710 }
  0xa0   : > { %v717_v37 = vsel %vm716_vm6, %v711_v36, %v713_v34 }
  0xa1   : > { %1231 = vmatmul.mubr.msk.bf16.vlgmr.msra.gmra.mrb[8].mxu0 %vm361_vm1, %v1229_v35  ;;  %v776_v38 = vpop.permute.xlu1 %775  ;;  %v723_v41 = vsel %vm365_vm0, %v717_v37, 0 }
  0xa2   : > { %825 = vmatprep.mubr.bf16.mxu0 %v1310_v0 }
  0xa3   : > { %v715_v39 = vpop.permute.xlu0 %714 }
  0xa4   : > { %v718_v40 = vsel %vm716_vm6, %v713_v34, %v715_v39 }
  0xa5   : > { %1233 = vmatprep.subr.msk.bf16.mxu1 %vm365_vm0, %v718_v40  ;;  %v780_v42 = vpop.permute.xlu1 %779 }
  0xa6   : > { %729 = vmatpush1.bf16.msra.mxu1 %v723_v41 }
  0xa7   : > { %v778_v44 = vpop.permute.xlu0 %777 }
  0xa8   : > { %v782_v45 = vsel %vm781_vm7, %v776_v38, %v778_v44  ;;  %v783_v46 = vsel %vm781_vm7, %v778_v44, %v780_v42 }
  0xa9   : > { %v788_v47 = vsel %vm365_vm0, %v782_v45, 0  ;;  %1234 = vmatmul.mubr.msk.bf16.vlgmr.msra.gmra.mrb[8].mxu1 %vm361_vm1, %v1232_v43  ;;  %1236 = vmatprep.subr.msk.bf16.mxu0 %vm365_vm0, %v783_v46  ;;  %v843_v48 = vpop.permute.xlu1 %842 }
  0xaa   : > { %794 = vmatpush1.bf16.msra.mxu0 %v788_v47  ;;  %890 = vmatprep.mubr.bf16.mxu1 %v1310_v0 }
  0xab   : > { %v841_v50 = vpop.permute.xlu0 %840 }
  0xac   : > { %v847_v51 = vsel %vm846_vm8, %v841_v50, %v843_v48 }
  0xad   : > { %1237 = vmatmul.mubr.msk.bf16.vlgmr.msra.gmra.mrb[12].mxu0 %vm361_vm1, %v1235_v49  ;;  %v904_v52 = vpop.permute.xlu1 %903  ;;  %v853_v55 = vsel %vm365_vm0, %v847_v51, 0 }
  0xae   : > { %953 = vmatprep.mubr.bf16.mxu0 %v1310_v0 }
  0xaf   : > { %v845_v53 = vpop.permute.xlu0 %844 }
  0xb0   : > { %v848_v54 = vsel %vm846_vm8, %v843_v48, %v845_v53 }
  0xb1   : > { %1239 = vmatprep.subr.msk.bf16.mxu1 %vm365_vm0, %v848_v54  ;;  %v908_v56 = vpop.permute.xlu1 %907 }
  0xb2   : > { %859 = vmatpush1.bf16.msra.mxu1 %v853_v55 }
  0xb3   : > { %v906_v58 = vpop.permute.xlu0 %905 }
  0xb4   : > { %v910_v59 = vsel %vm909_vm9, %v904_v52, %v906_v58  ;;  %v911_v60 = vsel %vm909_vm9, %v906_v58, %v908_v56 }
  0xb5   : > { %v916_v61 = vsel %vm365_vm0, %v910_v59, 0  ;;  %1240 = vmatmul.mubr.msk.bf16.vlgmr.msra.gmra.mrb[12].mxu1 %vm361_vm1, %v1238_v57  ;;  %1242 = vmatprep.subr.msk.bf16.mxu0 %vm365_vm0, %v911_v60 }
  0xb6   : > { %922 = vmatpush1.bf16.msra.mxu0 %v916_v61 }
  0xb9   : > { %1243 = vmatmul.mubr.msk.bf16.vlgmr.msra.gmra.mrb[16].mxu0 %vm361_vm1, %v1241_v62 }
  0xec   : > { %v406_v63 = vpop.f32.mrb[0].mxu0 }
  0xed   : > { %v408_v0 = vpop.f32.mrb[1].mxu0  ;;  %v425_v16 = vmul.f32 %v418_v14, %v406_v63 }
  0xee   : > { %v410_v1 = vpop.f32.mrb[2].mxu0  ;;  %v426_v17 = vmul.f32 %v422_v15, %v408_v0 }
  0xef   : > { %v411_v2 = vpop.f32.mrb[3].mxu0 }
 0x164   : > { %v493_v19 = vpop.f32.mrb[0].mxu1 }
 0x165   : > { %v500_v20 = vadd.f32 %v493_v19, %v425_v16  ;;  %v495_v21 = vpop.f32.mrb[1].mxu1 }
 0x166   : > { %v501_v23 = vadd.f32 %v495_v21, %v426_v17  ;;  %v497_v24 = vpop.f32.mrb[2].mxu1  ;;  %v983_v21 = vpop.xlane.xlu0 %982 }
 0x167   : > { %v498_v26 = vpop.f32.mrb[3].mxu1 }
 0x168   : > { %v556_v27 = vpop.f32.mrb[4].mxu0 }
 0x169   : > { %v576_v28 = vmul.f32 %v569_v22, %v556_v27  ;;  %v558_v29 = vpop.f32.mrb[5].mxu0 }
 0x16a   : > { %v577_v30 = vmul.f32 %v573_v25, %v558_v29  ;;  %v560_v31 = vpop.f32.mrb[6].mxu0 }
 0x16b   : > { %v578_v32 = vadd.f32 %v576_v28, %v500_v20  ;;  %v561_v33 = vpop.f32.mrb[7].mxu0 }
 0x16c   : > { %v579_v34 = vadd.f32 %v577_v30, %v501_v23 }
 0x170   : > { %v634_v35 = vpop.f32.mrb[4].mxu1 }
 0x171   : > { %v641_v36 = vmul.f32 %v634_v35, %v418_v14  ;;  %v636_v37 = vpop.f32.mrb[5].mxu1 }
 0x172   : > { %v642_v38 = vmul.f32 %v636_v37, %v422_v15  ;;  %v638_v39 = vpop.f32.mrb[6].mxu1 }
 0x173   : > { %v643_v40 = vadd.f32 %v641_v36, %v578_v32  ;;  %v639_v41 = vpop.f32.mrb[7].mxu1 }
 0x174   : > { %v699_v42 = vpop.f32.mrb[8].mxu0  ;;  %v644_v43 = vadd.f32 %v642_v38, %v579_v34 }
 0x175   : > { %v706_v44 = vadd.f32 %v699_v42, %v643_v40  ;;  %v701_v45 = vpop.f32.mrb[9].mxu0 }
 0x176   : > { %v707_v46 = vadd.f32 %v701_v45, %v644_v43  ;;  %v703_v47 = vpop.f32.mrb[10].mxu0 }
 0x177   : > { %v704_v48 = vpop.f32.mrb[11].mxu0 }
 0x17c   : > { %v762_v49 = vpop.f32.mrb[8].mxu1 }
 0x17d   : > { %v769_v50 = vmul.f32 %v762_v49, %v569_v22  ;;  %v764_v51 = vpop.f32.mrb[9].mxu1 }
 0x17e   : > { %v770_v52 = vmul.f32 %v764_v51, %v573_v25  ;;  %v766_v53 = vpop.f32.mrb[10].mxu1 }
 0x17f   : > { %v771_v54 = vadd.f32 %v769_v50, %v706_v44  ;;  %v767_v55 = vpop.f32.mrb[11].mxu1 }
 0x180   : > { %v772_v56 = vadd.f32 %v770_v52, %v707_v46  ;;  %v827_v57 = vpop.f32.mrb[12].mxu0 }
 0x181   : > { %v834_v58 = vmul.f32 %v827_v57, %v418_v14  ;;  %v829_v59 = vpop.f32.mrb[13].mxu0 }
 0x182   : > { %v835_v60 = vmul.f32 %v829_v59, %v422_v15  ;;  %v831_v61 = vpop.f32.mrb[14].mxu0 }
 0x183   : > { %v836_v62 = vadd.f32 %v834_v58, %v771_v54  ;;  %v832_v63 = vpop.f32.mrb[15].mxu0 }
 0x184   : > { %v837_v0 = vadd.f32 %v835_v60, %v772_v56 }
 0x188   : > { %v892_v1 = vpop.f32.mrb[12].mxu1 }
 0x189   : > { %v899_v2 = vadd.f32 %v892_v1, %v836_v62  ;;  %v894_v3 = vpop.f32.mrb[13].mxu1 }
 0x18a   : > { %v900_v4 = vadd.f32 %v894_v3, %v837_v0  ;;  %v896_v6 = vpop.f32.mrb[14].mxu1 }
 0x18b   : > { %v897_v7 = vpop.f32.mrb[15].mxu1 }
 0x18c   : > { %v955_v10 = vpop.f32.mrb[16].mxu0 }
 0x18d   : > { %v962_v11 = vmul.f32 %v955_v10, %v569_v22  ;;  %v957_v12 = vpop.f32.mrb[17].mxu0  ;;  %v989_v22 = vmax.f32 %v983_v21, 1.0 }
 0x18e   : > { %v963_v13 = vmul.f32 %v957_v12, %v573_v25  ;;  %v959_v14 = vpop.f32.mrb[18].mxu0 }
 0x18f   : > { %v964_v15 = vadd.f32 %v962_v11, %v899_v2  ;;  %v960_v16 = vpop.f32.mrb[19].mxu0  ;;  %v993_v23 = vrot.slane %v989_v22, %v1441_v5 }
 0x190   : > { %v965_v17 = vadd.f32 %v963_v13, %v900_v4 }
 0x191   : > { %1008 = vst [vmem:[%s337_s20] sm:$0xff] %v964_v15  ;;  %v984_v18 = vmul.f32 %v1447_v8, %v964_v15  ;;  %1284 = vrcp.f32 %v993_v23 }
 0x192   : > { %1009 = vst [vmem:[%s337_s20 + $0x8] sm:$0xff] %v965_v17  ;;  %v985_v19 = vmul.f32 %v1449_v9, %v965_v17 }
 0x194   : > { %v986_v20 = vadd.f32 %v985_v19, %v984_v18 }
 0x196   : > { %987 = vadd.xlane.f32.xlu1 %v986_v20 }
 0x19b   : > { %v1285_v24 = vpop.eup %1284 }
 0x223   : > { %v988_v25 = vpop.xlane.xlu1 %987 }
 0x224   : > { %v995_v26 = vmul.f32 %v1285_v24, %v988_v25  ;;  %1001 = vst.msk [vmem:[%s345_s28] sm:$0xff] %vm1000_vm11, %v988_v25 }
 0x226   : > { %v996_v27 = vsub.f32 %v964_v15, %v995_v26  ;;  %v997_v28 = vsub.f32 %v965_v17, %v995_v26 }
 0x228   : > { %v998_v29 = vmul.f32 %v996_v27, %v1447_v8  ;;  %v999_v30 = vmul.f32 %v997_v28, %v1449_v9 }
 0x22a   : > { %v1002_v31 = vmul.f32 %v998_v29, %v998_v29  ;;  %v1003_v32 = vmul.f32 %v999_v30, %v999_v30 }
 0x22c   : > { %v1004_v5 = vadd.f32 %v1003_v32, %v1002_v31 }
 0x22e   : > { %1005 = vadd.xlane.f32.xlu0 %v1004_v5 }
 0x2bb   : > { %v1006_v33 = vpop.xlane.xlu0 %1005 }
 0x2bc   : > { %1007 = vst.msk [vmem:[%s352_s30] sm:$0xff] %vm1000_vm11, %v1006_v33 }
 0x2bd PF: > { %s17_s23 = sadd.s32 1, %s1308_s23   ;;  %s1493_s21 = smov %s1304_s22 }
 0x2be   : > { %p14_p5 = scmp.ge.s32.totalorder %s17_s23, 4   ;;  %s1494_s22 = smov %s1496_s24 }
 0x2c0   :  { %16 = sbr.rel (!%p14_p5) target bundleno = 2 (0x2), region = 105 }

</bundles_post_ra>
